<compile_context>
chip_gen: v5e
topology: v5e:2x2
jax: 0.10.0
libtpu: 0.0.40
codegen_flags: <defaults>
</compile_context>

<pallas_src>
import math

import jax
import jax.numpy as jnp
from jax.experimental import pallas as pl
from jax.experimental.pallas import tpu as pltpu


def _hbm_copy_kernel(x_hbm, o_hbm, sem):
    # Single whole-array HBM->HBM DMA: the contiguous transfer runs at HBM
    # bandwidth on the DMA engine while the TensorCore stays free.
    cp = pltpu.make_async_copy(x_hbm, o_hbm, sem)
    cp.start()
    cp.wait()


def _pallas_materialized_copy(x2):
    """Copy the flattened (N, flat) slab into a fresh buffer via HBM->HBM DMA."""
    n, flat = x2.shape
    itemsize = jnp.dtype(x2.dtype).itemsize
    return pl.pallas_call(
        _hbm_copy_kernel,
        out_shape=jax.ShapeDtypeStruct((n, flat), x2.dtype),
        in_specs=[pl.BlockSpec(memory_space=pl.ANY)],
        out_specs=pl.BlockSpec(memory_space=pl.ANY),
        scratch_shapes=[pltpu.SemaphoreType.DMA],
        cost_estimate=pl.CostEstimate(
            flops=0,
            transcendentals=0,
            bytes_accessed=2 * n * flat * itemsize,
        ),
    )(x2)


def reshape_forward(x, *, materialize=False):
    """Equivalent of `xs.reshape((xs.shape[0], -1))` for any-rank input.

    materialize=False (default, recommended): metadata-only reshape — free.
    materialize=True: additionally force a fresh buffer via the Pallas
    HBM->HBM DMA copy kernel.
    """
    n = x.shape[0]
    flat = int(math.prod(x.shape[1:])) if x.ndim > 1 else 1

    # Metadata-only flatten; identical element order to torch.Tensor.reshape
    # on a contiguous NCHW tensor.
    x2 = jnp.reshape(x, (n, flat))
    if not materialize:
        return x2
    return _pallas_materialized_copy(x2)


if __name__ == "__main__":
    key = jax.random.PRNGKey(0)
    x = jax.random.normal(key, (2, 4, 16, 16), dtype=jnp.float32)

    ref = x.reshape(x.shape[0], -1)

    # Fast (metadata-only) path — the recommended default per the perf review.
    out_fast = jax.block_until_ready(reshape_forward(x))
    assert out_fast.shape == (2, 4 * 16 * 16), out_fast.shape
    assert out_fast.dtype == x.dtype
    assert jnp.array_equal(out_fast, ref), "fast-path reshape mismatch"

    # Pallas kernel path (explicitly materialized HBM->HBM DMA copy).
    out_kernel = jax.block_until_ready(reshape_forward(x, materialize=True))
    assert out_kernel.shape == (2, 4 * 16 * 16), out_kernel.shape
    assert out_kernel.dtype == x.dtype
    assert jnp.array_equal(out_kernel, ref), "Pallas DMA-copy reshape mismatch"

    print("KERNEL_OK")
</pallas_src>

<mosaic_0001>
module attributes {stable_mosaic.version = 11 : i64} {
  func.func @_hbm_copy_kernel(%arg0: memref<2x1024xf32, #tpu.memory_space<any>>, %arg1: memref<2x1024xf32, #tpu.memory_space<any>>, %arg2: memref<!tpu.dma_semaphore, #tpu.memory_space<semaphore_mem>>) attributes {dimension_semantics = [], scalar_prefetch = 0 : i64, scratch_operands = 1 : i64, tpu.core_type = #tpu.core_type<tc>} {
    tpu.enqueue_dma source(%arg0 : memref<2x1024xf32, #tpu.memory_space<any>>) target(%arg1 : memref<2x1024xf32, #tpu.memory_space<any>>) target_semaphore(%arg2 : memref<!tpu.dma_semaphore, #tpu.memory_space<semaphore_mem>>)
    tpu.wait_dma2 semaphore(%arg2 : memref<!tpu.dma_semaphore, #tpu.memory_space<semaphore_mem>>) src(%arg0 : memref<2x1024xf32, #tpu.memory_space<any>>) dst(%arg1 : memref<2x1024xf32, #tpu.memory_space<any>>)
    return
  }
}

</mosaic_0001>

<bundles_post_ra>
// kernel: tpu_custom_call.1
= control target key start
LH: loop header
LB: loop body
LE: loop exit
PB: predicated region body
PF: predicated region fallthrough
CT: control target
= control target key end

     0   :  { %s33_s12 = smov [#allocation2]   ;;  %s34_s13 = smov [#allocation3]   ;;  %s52_s0 = inlined_call_operand.hbm [shape: f32[2,1024], index: 0, kind: input, shape index: {}]   ;;  %s53_s1 = inlined_call_operand.hbm [shape: f32[2,1024], index: 1, kind: output, shape index: {}]  }
   0x1   :  { %s10_s8 = sshll.u32 %s52_s0, 4  ;;  %s12_s11 = sshll.u32 %s53_s1, 4  ;;  %s11_s8 = int_to_ptr.hbm [resolvable:$true] %s10_s8  ;;  %s13_s11 = int_to_ptr.hbm [resolvable:$true] %s12_s11 }
   0x2   :  { %s35_s14 = smov 0  }
   0x3   :  { %16 = dma.general %s11_s8, 256, %s13_s11, %s33_s12, %s34_s13, [#allocation4], %s35_s14, 0  }
   0x4   :  { %31 = dma.done.wait [#allocation2], 256 }
   0x5   :  { %32 = vsyncadd [#allocation2], 4294967040 }
   0x6   :  { %21 = vsyncmov [#allocation2] }
   0x9   :  { %s22_s15 = vpop.sfrf %21 }
   0xa   :  { %p27_p0 = scmp.ne.s32.totalorder %s22_s15, 0 }
   0xc   :  { %26 = shalt.err (%p27_p0)  }

</bundles_post_ra>
